<compile_context>
chip_gen: v7x
topology: tpu7x:2x2x1
jax: 0.10.0
libtpu: 0.0.40
codegen_flags: <defaults>
</compile_context>

<pallas_src>
import math

import jax
import jax.numpy as jnp
from jax import lax
from jax.experimental import pallas as pl
from jax.experimental.pallas import tpu as pltpu


# ---------------------------------------------------------------------------
# Parameter construction (replicates creak_layer_mask deterministically)
# ---------------------------------------------------------------------------
def calculate_mask_index(kernel_length_now, largest_kernel_length):
    right = math.ceil((largest_kernel_length - 1) / 2) - math.ceil((kernel_length_now - 1) / 2)
    left = largest_kernel_length - kernel_length_now - right
    return left, left + kernel_length_now


def build_params(layer_parameter_list, key):
    """Build (mask, init_weight, init_bias) like creak_layer_mask, with
    deterministic jax.random init instead of torch Conv1d init."""
    K = layer_parameter_list[-1][-1]
    masks, weights, biases = [], [], []
    for (cin, cout, k) in layer_parameter_list:
        key, wk, bk = jax.random.split(key, 3)
        ind_l, ind_r = calculate_mask_index(k, K)
        bound = 1.0 / math.sqrt(cin * k)          # PyTorch Conv1d default init bound
        w = jax.random.uniform(wk, (cout, cin, k), jnp.float32, -bound, bound)
        b = jax.random.uniform(bk, (cout,), jnp.float32, -bound, bound)
        big_w = jnp.zeros((cout, cin, K), jnp.float32).at[:, :, ind_l:ind_r].set(w)
        m = jnp.ones((cout, cin, K), jnp.float32)
        m = m.at[:, :, :ind_l].set(0.0).at[:, :, ind_r:].set(0.0)
        masks.append(m)
        weights.append(big_w)
        biases.append(b)
    return (jnp.concatenate(masks, axis=0),
            jnp.concatenate(weights, axis=0),
            jnp.concatenate(biases, axis=0))


def _round_up(a, b):
    return (a + b - 1) // b * b


# ---------------------------------------------------------------------------
# Pass 1: im2col matmul + per-channel sum / sum-of-squares accumulation
#   grid axis = tiles of the flattened N*L (lane) dim, "arbitrary" (stats reduce)
# ---------------------------------------------------------------------------
def conv_stats_kernel(w_ref, p_ref, conv_ref, sum_ref, sq_ref):
    @pl.when(pl.program_id(0) == 0)
    def _():
        sum_ref[...] = jnp.zeros_like(sum_ref)
        sq_ref[...] = jnp.zeros_like(sq_ref)

    # (C_out_p, C_in*K) x (C_in*K, TL) -> (C_out_p, TL), f32 accumulation on MXU.
    conv = jnp.dot(w_ref[...], p_ref[...], preferred_element_type=jnp.float32)
    conv_ref[...] = conv.astype(conv_ref.dtype)

    # Per-channel partial stats (padded columns are exactly zero -> no bias in stats).
    sum_ref[...] += jnp.sum(conv, axis=1, keepdims=True)
    sq_ref[...] += jnp.sum(conv * conv, axis=1, keepdims=True)


# ---------------------------------------------------------------------------
# Pass 2: y = relu(conv * scale + shift)   (scale/shift fold BN gamma/beta/mean/var)
# ---------------------------------------------------------------------------
def bn_relu_kernel(conv_ref, scale_ref, shift_ref, out_ref):
    y = conv_ref[...] * scale_ref[...] + shift_ref[...]
    out_ref[...] = jnp.maximum(y, 0.0).astype(out_ref.dtype)


# ---------------------------------------------------------------------------
# Wrapper
# ---------------------------------------------------------------------------
def oscnn_forward(x, weight, mask, bias, gamma, beta, eps=1e-5):
    # Bias is added before training-mode BatchNorm -> it cancels exactly in the
    # mean subtraction, so we drop it (saves a DMA + a full VPU pass).
    del bias
    N, C_in, L = x.shape
    C_out, _, K = weight.shape

    # Fold the static mask into the weights once; im2col weight layout (C_out, C_in*K).
    w2 = (weight * mask).reshape(C_out, C_in * K)

    # Asymmetric "same" padding: ConstantPad1d((int((K-1)/2), int(K/2)), 0).
    pad_l, pad_r = (K - 1) // 2, K // 2
    xpad = jnp.pad(x, ((0, 0), (0, 0), (pad_l, pad_r)))

    # im2col (layout plumbing done by XLA, outside the kernel):
    # patches[c*K + t, n*L + l] = xpad[n, c, l + t]
    patches = jnp.stack([xpad[:, :, t:t + L] for t in range(K)], axis=2)   # (N, C_in, K, L)
    patches = patches.transpose(1, 2, 0, 3).reshape(C_in * K, N * L)       # (C_in*K, N*L)

    NL = N * L
    CK = C_in * K
    C_out_p = _round_up(C_out, 8)                         # sublane-aligned channel dim
    TL = 512 if NL >= 512 else _round_up(NL, 128)         # lane-dense tile (>=128)
    NLp = _round_up(NL, TL)

    w2p = jnp.zeros((C_out_p, CK), jnp.float32).at[:C_out, :].set(w2.astype(jnp.float32))
    patches_p = jnp.zeros((CK, NLp), patches.dtype).at[:, :NL].set(patches)

    grid = (NLp // TL,)
    vmem_cap = 32 * 1024 * 1024  # fits v7x's smaller VMEM; tiles are far below this

    conv, sums, sumsqs = pl.pallas_call(
        conv_stats_kernel,
        out_shape=(jax.ShapeDtypeStruct((C_out_p, NLp), jnp.float32),
                   jax.ShapeDtypeStruct((C_out_p, 1), jnp.float32),
                   jax.ShapeDtypeStruct((C_out_p, 1), jnp.float32)),
        grid_spec=pltpu.PrefetchScalarGridSpec(
            num_scalar_prefetch=0,
            grid=grid,
            in_specs=[pl.BlockSpec((C_out_p, CK), lambda j: (0, 0)),   # weights resident
                      pl.BlockSpec((CK, TL), lambda j: (0, j))],       # patch tiles
            out_specs=[pl.BlockSpec((C_out_p, TL), lambda j: (0, j)),  # conv tiles
                       pl.BlockSpec((C_out_p, 1), lambda j: (0, 0)),   # sum accumulator
                       pl.BlockSpec((C_out_p, 1), lambda j: (0, 0))]), # sumsq accumulator
        compiler_params=pltpu.CompilerParams(
            dimension_semantics=("arbitrary",),           # stats reduce across tiles
            vmem_limit_bytes=vmem_cap),
    )(w2p, patches_p)

    # Finalize global BN statistics (tiny per-channel vectors; padded cols contribute 0).
    count = jnp.float32(NL)
    mean = sums[:, 0] / count
    var = jnp.maximum(sumsqs[:, 0] / count - mean * mean, 0.0)   # biased variance
    rstd = lax.rsqrt(var + eps)
    gamma_p = jnp.ones((C_out_p,), jnp.float32).at[:C_out].set(gamma.astype(jnp.float32))
    beta_p = jnp.zeros((C_out_p,), jnp.float32).at[:C_out].set(beta.astype(jnp.float32))
    scale = (gamma_p * rstd).reshape(C_out_p, 1)
    shift = (beta_p - mean * gamma_p * rstd).reshape(C_out_p, 1)

    out = pl.pallas_call(
        bn_relu_kernel,
        out_shape=jax.ShapeDtypeStruct((C_out_p, NLp), x.dtype),
        grid_spec=pltpu.PrefetchScalarGridSpec(
            num_scalar_prefetch=0,
            grid=grid,
            in_specs=[pl.BlockSpec((C_out_p, TL), lambda j: (0, j)),
                      pl.BlockSpec((C_out_p, 1), lambda j: (0, 0)),
                      pl.BlockSpec((C_out_p, 1), lambda j: (0, 0))],
            out_specs=pl.BlockSpec((C_out_p, TL), lambda j: (0, j))),
        compiler_params=pltpu.CompilerParams(
            dimension_semantics=("parallel",),            # independent tiles (2 TCs on v7x)
            vmem_limit_bytes=vmem_cap),
    )(conv, scale, shift)

    out = out[:C_out, :NL].reshape(C_out, N, L)
    return jnp.transpose(out, (1, 0, 2))                  # NCW, matches PyTorch


# ---------------------------------------------------------------------------
# Pure-JAX reference (mirrors the PyTorch module, bias included) for validation
# ---------------------------------------------------------------------------
def reference_forward(x, weight, mask, bias, gamma, beta, eps=1e-5):
    N, C_in, L = x.shape
    C_out, _, K = weight.shape
    w = weight * mask
    pad_l, pad_r = (K - 1) // 2, K // 2
    xpad = jnp.pad(x, ((0, 0), (0, 0), (pad_l, pad_r)))
    patches = jnp.stack([xpad[:, :, t:t + L] for t in range(K)], axis=2)   # (N, C_in, K, L)
    conv = jnp.einsum('ock,nckl->nol', w, patches) + bias[None, :, None]
    mean = conv.mean(axis=(0, 2), keepdims=True)
    var = ((conv - mean) ** 2).mean(axis=(0, 2), keepdims=True)
    y = gamma[None, :, None] * (conv - mean) * lax.rsqrt(var + eps) + beta[None, :, None]
    return jnp.maximum(y, 0.0)


# TODO(synk): BatchNorm running_mean/running_var momentum updates are a training-only
# side effect that does not influence this forward's output; not implemented.

if __name__ == "__main__":
    # layer_parameters: list of (in_channels, out_channels, kernel_size)
    layer_parameters = [(4, 8, 3), (4, 8, 5), (4, 8, 7)]
    key = jax.random.PRNGKey(0)
    key, xk, gk, bk = jax.random.split(key, 4)

    mask, weight, bias = build_params(layer_parameters, key)
    C_out = weight.shape[0]
    gamma = jax.random.uniform(gk, (C_out,), jnp.float32, 0.5, 1.5)   # BN affine weight
    beta = 0.1 * jax.random.normal(bk, (C_out,), jnp.float32)         # BN affine bias

    x = jax.random.normal(xk, (2, 4, 16), jnp.float32)                # (N, C_in, L)

    out = jax.block_until_ready(oscnn_forward(x, weight, mask, bias, gamma, beta))
    assert out.shape == (2, C_out, 16), out.shape
    assert bool(jnp.all(out >= 0.0))                                  # ReLU non-negativity

    ref = jax.block_until_ready(reference_forward(x, weight, mask, bias, gamma, beta))
    max_err = float(jnp.max(jnp.abs(out - ref)))
    assert max_err < 1e-3, f"max abs error vs reference: {max_err}"

    print("KERNEL_OK")
</pallas_src>

<mosaic_0001>
module attributes {stable_mosaic.version = 11 : i64} {
  func.func @conv_stats_kernel(%arg0: i32, %arg1: memref<24x28xf32, #tpu.memory_space<vmem>>, %arg2: memref<28x128xf32, #tpu.memory_space<vmem>>, %arg3: memref<24x128xf32, #tpu.memory_space<vmem>>, %arg4: memref<24x1xf32, #tpu.memory_space<vmem>>, %arg5: memref<24x1xf32, #tpu.memory_space<vmem>>) attributes {dimension_semantics = [#tpu.dimension_semantics<arbitrary>], iteration_bounds = array<i64: 1>, scalar_prefetch = 0 : i64, scratch_operands = 0 : i64, tpu.core_type = #tpu.core_type<tc>, window_params = [{pipeline_mode = #tpu.pipeline_mode<synchronous>, transform_indices = @transform_0, window_bounds = array<i64: 24, 28>}, {transform_indices = @transform_1, window_bounds = array<i64: 28, 128>}, {transform_indices = @transform_2, window_bounds = array<i64: 24, 128>}, {pipeline_mode = #tpu.pipeline_mode<synchronous>, transform_indices = @transform_3, window_bounds = array<i64: 24, 1>}, {pipeline_mode = #tpu.pipeline_mode<synchronous>, transform_indices = @transform_4, window_bounds = array<i64: 24, 1>}]} {
    %c0_i32 = arith.constant 0 : i32
    %0 = arith.cmpi eq, %arg0, %c0_i32 : i32
    %1 = arith.extui %0 : i1 to i32
    %c0_i32_0 = arith.constant 0 : i32
    %2 = arith.cmpi ne, %1, %c0_i32_0 : i32
    scf.if %2 {
      %cst_16 = arith.constant 0.000000e+00 : f32
      %18 = vector.broadcast %cst_16 : f32 to vector<24x1xf32>
      %c0_17 = arith.constant 0 : index
      %c0_18 = arith.constant 0 : index
      %19 = vector.load %arg4[%c0_17, %c0_18] : memref<24x1xf32, #tpu.memory_space<vmem>>, vector<24x1xf32>
      tpu.vector_store %arg4[%c0_17, %c0_18], %18 {strides = array<i32>} : memref<24x1xf32, #tpu.memory_space<vmem>>, vector<24x1xf32>,
      %cst_19 = arith.constant 0.000000e+00 : f32
      %20 = vector.broadcast %cst_19 : f32 to vector<24x1xf32>
      %c0_20 = arith.constant 0 : index
      %c0_21 = arith.constant 0 : index
      %21 = vector.load %arg5[%c0_20, %c0_21] : memref<24x1xf32, #tpu.memory_space<vmem>>, vector<24x1xf32>
      tpu.vector_store %arg5[%c0_20, %c0_21], %20 {strides = array<i32>} : memref<24x1xf32, #tpu.memory_space<vmem>>, vector<24x1xf32>,
    } else {
    }
    %c0 = arith.constant 0 : index
    %c0_1 = arith.constant 0 : index
    %3 = vector.load %arg1[%c0, %c0_1] : memref<24x28xf32, #tpu.memory_space<vmem>>, vector<24x28xf32>
    %c0_2 = arith.constant 0 : index
    %c0_3 = arith.constant 0 : index
    %4 = vector.load %arg2[%c0_2, %c0_3] : memref<28x128xf32, #tpu.memory_space<vmem>>, vector<28x128xf32>
    %cst = arith.constant dense<0.000000e+00> : vector<24x128xf32>
    %5 = tpu.matmul %3, %4, %cst {dimension_numbers = #tpu.dot_dimension_numbers<[1], [0], [0], [1], [0, 0, 1, 1], [], []>} : vector<24x28xf32>, vector<28x128xf32>, vector<24x128xf32> -> vector<24x128xf32>
    %c0_4 = arith.constant 0 : index
    %c0_5 = arith.constant 0 : index
    %6 = vector.load %arg3[%c0_4, %c0_5] : memref<24x128xf32, #tpu.memory_space<vmem>>, vector<24x128xf32>
    tpu.vector_store %arg3[%c0_4, %c0_5], %5 {strides = array<i32>} : memref<24x128xf32, #tpu.memory_space<vmem>>, vector<24x128xf32>,
    %c0_6 = arith.constant 0 : index
    %c0_7 = arith.constant 0 : index
    %7 = vector.load %arg4[%c0_6, %c0_7] : memref<24x1xf32, #tpu.memory_space<vmem>>, vector<24x1xf32>
    %cst_8 = arith.constant dense<0.000000e+00> : vector<24xf32>
    %8 = vector.multi_reduction <add>, %5, %cst_8 [1] : vector<24x128xf32> to vector<24xf32>
    %9 = vector.shape_cast %8 : vector<24xf32> to vector<24x1xf32>
    %10 = arith.addf %7, %9 : vector<24x1xf32>
    %c0_9 = arith.constant 0 : index
    %c0_10 = arith.constant 0 : index
    %11 = vector.load %arg4[%c0_9, %c0_10] : memref<24x1xf32, #tpu.memory_space<vmem>>, vector<24x1xf32>
    tpu.vector_store %arg4[%c0_9, %c0_10], %10 {strides = array<i32>} : memref<24x1xf32, #tpu.memory_space<vmem>>, vector<24x1xf32>,
    %c0_11 = arith.constant 0 : index
    %c0_12 = arith.constant 0 : index
    %12 = vector.load %arg5[%c0_11, %c0_12] : memref<24x1xf32, #tpu.memory_space<vmem>>, vector<24x1xf32>
    %13 = arith.mulf %5, %5 : vector<24x128xf32>
    %cst_13 = arith.constant dense<0.000000e+00> : vector<24xf32>
    %14 = vector.multi_reduction <add>, %13, %cst_13 [1] : vector<24x128xf32> to vector<24xf32>
    %15 = vector.shape_cast %14 : vector<24xf32> to vector<24x1xf32>
    %16 = arith.addf %12, %15 : vector<24x1xf32>
    %c0_14 = arith.constant 0 : index
    %c0_15 = arith.constant 0 : index
    %17 = vector.load %arg5[%c0_14, %c0_15] : memref<24x1xf32, #tpu.memory_space<vmem>>, vector<24x1xf32>
    tpu.vector_store %arg5[%c0_14, %c0_15], %16 {strides = array<i32>} : memref<24x1xf32, #tpu.memory_space<vmem>>, vector<24x1xf32>,
    return
  }
  func.func @transform_0(%arg0: i32) -> (i32, i32) {
    %c0_i32 = arith.constant 0 : i32
    %c0_i32_0 = arith.constant 0 : i32
    %c0_i32_1 = arith.constant 0 : i32
    return %c0_i32, %c0_i32_0 : i32, i32
  }
  func.func @transform_1(%arg0: i32) -> (i32, i32) {
    %c0_i32 = arith.constant 0 : i32
    %c0_i32_0 = arith.constant 0 : i32
    return %c0_i32, %arg0 : i32, i32
  }
  func.func @transform_2(%arg0: i32) -> (i32, i32) {
    %c0_i32 = arith.constant 0 : i32
    %c0_i32_0 = arith.constant 0 : i32
    return %c0_i32, %arg0 : i32, i32
  }
  func.func @transform_3(%arg0: i32) -> (i32, i32) {
    %c0_i32 = arith.constant 0 : i32
    %c0_i32_0 = arith.constant 0 : i32
    %c0_i32_1 = arith.constant 0 : i32
    return %c0_i32, %c0_i32_0 : i32, i32
  }
  func.func @transform_4(%arg0: i32) -> (i32, i32) {
    %c0_i32 = arith.constant 0 : i32
    %c0_i32_0 = arith.constant 0 : i32
    %c0_i32_1 = arith.constant 0 : i32
    return %c0_i32, %c0_i32_0 : i32, i32
  }
}

</mosaic_0001>

<bundles_post_ra>
// kernel: tpu_custom_call.1
= control target key start
LH: loop header
LB: loop body
LE: loop exit
PB: predicated region body
PF: predicated region fallthrough
CT: control target
= control target key end

     0   :  { %10 = vsyncpa [#allocation3], 0  ;;  %s486_s0 = inlined_call_operand.hbm [shape: f32[24,28], index: 0, kind: input, shape index: {}]   ;;  %s487_s1 = inlined_call_operand.hbm [shape: f32[28,128], index: 1, kind: input, shape index: {}]   ;;  %s488_s2 = inlined_call_operand.hbm [shape: f32[24,128], index: 2, kind: output, shape index: {0}]   ;;  %s489_s3 = inlined_call_operand.vmem [shape: f32[24,1], index: 3, kind: output, shape index: {1}]   ;;  %s490_s4 = inlined_call_operand.vmem [shape: f32[24,1], index: 4, kind: output, shape index: {2}]  }
   0x1   :  { %11 = vsyncpa [#allocation6], 0 }
   0x2   :  { %12 = vsyncpa [#allocation4], 0  ;;  %s338_s15 = smov [#allocation2]   ;;  %s266_s19 = scalar_lea.hbm %s486_s0, 384 }
   0x3   :  { %s18_s16 = sshll.u32 %s338_s15, 4  ;;  %p267_p0 = scmp.ne.s32.totalorder %s486_s0, %s266_s19  ;;  %s19_s16 = int_to_ptr.vmem [resolvable:$true] %s18_s16 }
   0x4   :  { %p270_p1 = scmp.lt.u32.totalorder %s266_s19, %s486_s0 }
   0x6   :  { %p272_p2 = pnand %p270_p1, %p267_p0 }
   0x8   :  { %275 = shalt.err (!%p272_p2)
}
   0x9   :  { %s276_s24 = scalar_lea.vmem %s19_s16, 384  ;;  %p281_p4 = scmp.lt.s32.totalorder %s19_s16, %s19_s16 }
   0xa   :  { %p277_p3 = scmp.ne.s32.totalorder %s19_s16, %s276_s24  ;;  %p282_p5 = scmp.lt.s32.totalorder %s276_s24, %s276_s24 }
   0xc   :  { %p283_p6 = por %p282_p5, %p281_p4 }
   0xe   :  { %p284_p7 = pnand %p283_p6, %p277_p3 }
  0x10   :  { %287 = shalt.err (!%p284_p7)
}
  0x11   :  { %s339_s25 = smov 128   ;;  %s340_s26 = smov 8  }
  0x12   :  { %24 = dma.hbm_to_vmem [thread:$0]  %s486_s0, 384, %s19_s16, [#allocation3], %s339_s25, %s339_s25, %s340_s26  }
  0x13   :  { %s341_s29 = smov [#allocation5]   ;;  %s288_s7 = scalar_lea.hbm %s487_s1, 512 }
  0x14   :  { %s30_s30 = sshll.u32 %s341_s29, 4  ;;  %p289_p8 = scmp.ne.s32.totalorder %s487_s1, %s288_s7  ;;  %s31_s30 = int_to_ptr.vmem [resolvable:$true] %s30_s30 }
  0x15   :  { %p292_p9 = scmp.lt.u32.totalorder %s288_s7, %s487_s1 }
  0x17   :  { %p294_p10 = pnand %p292_p9, %p289_p8 }
  0x19   :  { %297 = shalt.err (!%p294_p10)
}
  0x1a   :  { %s298_s12 = scalar_lea.vmem %s31_s30, 512  ;;  %p303_p12 = scmp.lt.s32.totalorder %s31_s30, %s31_s30 }
  0x1b   :  { %p299_p11 = scmp.ne.s32.totalorder %s31_s30, %s298_s12  ;;  %p304_p13 = scmp.lt.s32.totalorder %s298_s12, %s298_s12 }
  0x1d   :  { %p305_p0 = por %p304_p13, %p303_p12 }
  0x1f   :  { %p306_p1 = pnand %p305_p0, %p299_p11 }
  0x21   :  { %309 = shalt.err (!%p306_p1)
}
  0x22   :  { %36 = dma.hbm_to_vmem [thread:$0]  %s487_s1, 512, %s31_s30, [#allocation6], %s339_s25, %s339_s25, %s340_s26  }
  0x23   :  { %332 = dma.done.wait [#allocation3], 384  }
  0x24   :  { %333 = vsyncadd [#allocation3], 4294966912 }
  0x25   :  { %334 = dma.done.wait [#allocation6], 512  }
  0x26   :  { %335 = vsyncadd [#allocation6], 4294966784  ;;  %v342_v0 = vmov 0.0|0.0   ;;  %vm343_vm0 = vmmov 0   ;;  %v344_v1 = vmov 0.0   ;;  %v57_v2 = vld [vmem:[#allocation5] sm:$0xff] }
  0x27   :  { %246 = vmatprep.subr.bf16.mxu0 %v342_v0  ;;  %253 = vmatprep.subr.bf16.mxu1 %v342_v0  ;;  %v58_v3 = vld [vmem:[#allocation5 + $0x8] sm:$0xff]  ;;  %v59_v4 = vld [vmem:[#allocation5 + $0x10] sm:$0xff]  ;;  %v60_v6 = vld [vmem:[#allocation5 + $0x18] sm:$0xf]  ;;  %vm71_vm1 = vcmask 1043456   ;;  %vm345_vm2 = vmmov 1  }
  0x28   :  { %237 = vmatprep.mubr.msk.f32.mxu0 %vm343_vm0, %v344_v1  ;;  %240 = vmatprep.mubr.msk.f32.mxu1 %vm343_vm0, %v344_v1  ;;  %v247_v5 = vpack.c.bf16 %v58_v3, %v57_v2  ;;  %v250_v7 = vpack.c.bf16 %v60_v6, %v59_v4  ;;  %vm251_vm3 = vmpackc.low %vm71_vm1, %vm345_vm2  ;;  %v54_v8 = vld [vmem:[#allocation2] sm:$0xff]  ;;  %vm61_vm4 = vcmask 228352   ;;  %v55_v9 = vld [vmem:[#allocation2 + $0x8] sm:$0xff]  ;;  %vm47_vm5 = vcmask 7168   ;;  %s346_s27 = smov [#allocation7]  }
  0x29   :  { %v56_v10 = vld [vmem:[#allocation2 + $0x10] sm:$0xff]  ;;  %48 = vst.msk [vmem:[%s489_s3] sm:$0xff] %vm47_vm5, %v344_v1  ;;  %49 = vst.msk [vmem:[%s489_s3 + $0x8] sm:$0xff] %vm47_vm5, %v344_v1  ;;  %s197_s28 = sshll.u32 %s346_s27, 4  ;;  %s198_s28 = int_to_ptr.vmem [resolvable:$true] %s197_s28 }
  0x2a   :  { %248 = vmatpush3.bf16.msra.mxu0 %v247_v5  ;;  %255 = vmatpush3.bf16.msra.mxu1 %v247_v5  ;;  %50 = vst.msk [vmem:[%s489_s3 + $0x10] sm:$0xff] %vm47_vm5, %v344_v1  ;;  %51 = vst.msk [vmem:[%s490_s4] sm:$0xff] %vm47_vm5, %v344_v1  ;;  %s310_s29 = scalar_lea.vmem %s198_s28, 384  ;;  %p315_p3 = scmp.lt.s32.totalorder %s198_s28, %s198_s28 }
  0x2b   :  { %249 = vmatprep.subr.bf16.mxu0 %v342_v0  ;;  %254 = vmatprep.subr.bf16.mxu1 %v342_v0  ;;  %52 = vst.msk [vmem:[%s490_s4 + $0x8] sm:$0xff] %vm47_vm5, %v344_v1  ;;  %53 = vst.msk [vmem:[%s490_s4 + $0x10] sm:$0xff] %vm47_vm5, %v344_v1  ;;  %p311_p2 = scmp.ne.s32.totalorder %s198_s28, %s310_s29  ;;  %p316_p4 = scmp.lt.s32.totalorder %s310_s29, %s310_s29 }
  0x2d   :  { %p317_p5 = por %p316_p4, %p315_p3 }
  0x2e   :  { %252 = vmatpush3.bf16.msk.msra.mxu0 %vm251_vm3, %v250_v7  ;;  %256 = vmatpush3.bf16.msk.msra.mxu1 %vm251_vm3, %v250_v7 }
  0x2f   :  { %p318_p6 = pnand %p317_p5, %p311_p2 }
  0x31   :  { %238 = vmatmul.mubr.msk.f32.vlgmr.msra.gmra.mrb[0].mxu0 %vm61_vm4, %v54_v8  ;;  %241 = vmatmul.mubr.msk.f32.vlgmr.msra.gmra.mrb[0].mxu1 %vm61_vm4, %v55_v9 }
  0x32   :  { %243 = vmatprep.mubr.msk.f32.mxu1 %vm343_vm0, %v344_v1 }
  0x35   :  { %244 = vmatmul.mubr.msk.f32.gmra.mrb[2].mxu1 %vm61_vm4, %v56_v10 }
 0x104   :  { %v141_v11 = vpop.f32.mrb[0].mxu0  ;;  %v146_v12 = vpop.f32.mrb[0].mxu1 }
 0x105   :  { %155 = vst [vmem:[#allocation7] sm:$0xff] %v141_v11  ;;  %156 = vst [vmem:[#allocation7 + $0x8] sm:$0xff] %v146_v12  ;;  %161 = vadd.xlane.f32.xlu0 %v141_v11  ;;  %v239_v13 = vpop.f32.mrb[1].mxu0  ;;  %v242_v14 = vpop.f32.mrb[1].mxu1  ;;  %v177_v15 = vmul.f32 %v141_v11, %v141_v11  ;;  %v178_v18 = vmul.f32 %v146_v12, %v146_v12 }
 0x107   :  { %180 = vadd.xlane.f32.xlu1 %v177_v15 }
 0x108   :  { %v151_v16 = vpop.f32.mrb[2].mxu1 }
 0x109   :  { %157 = vst [vmem:[#allocation7 + $0x10] sm:$0xff] %v151_v16  ;;  %163 = vadd.xlane.f32.xlu0 %v146_v12  ;;  %v245_v17 = vpop.f32.mrb[3].mxu1  ;;  %v179_v19 = vmul.f32 %v151_v16, %v151_v16 }
 0x10b   :  { %165 = vadd.xlane.f32.xlu1 %v151_v16 }
 0x10d   :  { %182 = vadd.xlane.f32.xlu0 %v178_v18 }
 0x10f   :  { %184 = vadd.xlane.f32.xlu1 %v179_v19 }
 0x110   :  { %321 = shalt.err (!%p318_p6)
}
 0x111   :  { %s322_s6 = scalar_lea.hbm %s488_s2, 384 }
 0x112   :  { %p323_p7 = scmp.ne.s32.totalorder %s488_s2, %s322_s6  ;;  %p326_p8 = scmp.lt.u32.totalorder %s322_s6, %s488_s2 }
 0x114   :  { %p328_p9 = pnand %p326_p8, %p323_p7 }
 0x116   :  { %331 = shalt.err (!%p328_p9)
}
 0x117   :  { %203 = dma.vmem_to_hbm [thread:$0]  %s198_s28, 384, %s488_s2, [#allocation4], %s339_s25, %s339_s25, %s340_s26  }
 0x118   :  { %v158_v20 = vld [vmem:[%s489_s3] sm:$0xff]  ;;  %v159_v25 = vld [vmem:[%s489_s3 + $0x8] sm:$0xff]  ;;  %v160_v28 = vld [vmem:[%s489_s3 + $0x10] sm:$0xff] }
 0x119   :  { %v174_v22 = vld [vmem:[%s490_s4] sm:$0xff]  ;;  %v175_v31 = vld [vmem:[%s490_s4 + $0x8] sm:$0xff]  ;;  %v176_v34 = vld [vmem:[%s490_s4 + $0x10] sm:$0xff] }
 0x192   :  { %v162_v21 = vpop.xlane.xlu0 %161 }
 0x193   :  { %v167_v23 = vadd.f32 %v162_v21, %v158_v20 }
 0x194   :  { %v181_v24 = vpop.xlane.xlu1 %180 }
 0x195   :  { %171 = vst.msk [vmem:[%s489_s3] sm:$0xff] %vm47_vm5, %v167_v23  ;;  %v186_v26 = vadd.f32 %v181_v24, %v174_v22 }
 0x196   :  { %v164_v27 = vpop.xlane.xlu0 %163 }
 0x197   :  { %189 = vst.msk [vmem:[%s490_s4] sm:$0xff] %vm47_vm5, %v186_v26  ;;  %v168_v29 = vadd.f32 %v164_v27, %v159_v25 }
 0x198   :  { %v166_v30 = vpop.xlane.xlu1 %165 }
 0x199   :  { %172 = vst.msk [vmem:[%s489_s3 + $0x8] sm:$0xff] %vm47_vm5, %v168_v29  ;;  %v169_v32 = vadd.f32 %v166_v30, %v160_v28 }
 0x19a   :  { %v183_v33 = vpop.xlane.xlu0 %182 }
 0x19b   :  { %173 = vst.msk [vmem:[%s489_s3 + $0x10] sm:$0xff] %vm47_vm5, %v169_v32  ;;  %v187_v35 = vadd.f32 %v183_v33, %v175_v31 }
 0x19c   :  { %v185_v36 = vpop.xlane.xlu1 %184 }
 0x19d   :  { %190 = vst.msk [vmem:[%s490_s4 + $0x8] sm:$0xff] %vm47_vm5, %v187_v35  ;;  %v188_v37 = vadd.f32 %v185_v36, %v176_v34 }
 0x19f   :  { %191 = vst.msk [vmem:[%s490_s4 + $0x10] sm:$0xff] %vm47_vm5, %v188_v37 }
 0x1a0   :  { %336 = dma.done.wait [#allocation4], 384  }
 0x1a1   :  { %337 = vsyncadd [#allocation4], 4294966912 }
 0x1a2   :  { %215 = vsyncpa [#allocation3], 1 }
 0x1a3   :  { %216 = vsyncpa [#allocation6], 1 }
 0x1a4   :  { %217 = vsyncpa [#allocation4], 1 }

</bundles_post_ra>
